<compile_context>
chip_gen: v5e
topology: v5e:2x2
jax: 0.10.0
libtpu: 0.0.40
codegen_flags: <defaults>
</compile_context>

<pallas_src>
import functools

import jax
import jax.numpy as jnp
import numpy as np
from jax import lax
from jax.experimental import pallas as pl
from jax.experimental.pallas import tpu as pltpu


def _round_up(v, m):
    return ((v + m - 1) // m) * m


def _choose_batch_tile(B):
    """Pick (TB, Bp): TB a multiple of 128 (batch on lanes), Bp a multiple of TB."""
    Bp = _round_up(max(int(B), 1), 128)
    if Bp <= 256:
        return Bp, Bp                      # one small step; padding already minimal
    # Large batches: big tiles to amortize per-step overhead, but an even step count
    # >= 2 so both TensorCores get work on v7x megacore.
    n_steps = max(2, -(-Bp // 2048))
    if n_steps % 2:
        n_steps += 1
    TB = _round_up(-(-Bp // n_steps), 128)
    Bp = _round_up(Bp, TB)
    return TB, Bp


def _netdiscpidg_kernel(sp_ref,      # SMEM (1,)          sigma_perf scalar
                        xT_ref,      # (nin_full, TB)     raw input, batch on lanes
                        wbigT_ref,   # (Hp, nin_full)     [folded fc1 ; pid row ; zero pad]
                        bbigT_ref,   # (Hp, 1)            [fc1 bias ; w_const ; zero pad]
                        w2_ref,      # n_hl==1: (H/2, 1)  else (n_hl, H/2)
                        wstd_ref,    # (1, n_hl)
                        out_ref,     # (2, TB)            row 0 = mu, row 1 = sigma
                        *, h2, nh, nhl, std_min, std_max):
    # Fused fc1 (mask + normalizer folded in) plus the err_ftrs . pid + w_const row.
    h = jnp.dot(wbigT_ref[...], xT_ref[...],
                preferred_element_type=jnp.float32,
                precision=lax.Precision.HIGHEST) + bbigT_ref[...]     # (Hp, TB)

    a = h[:h2, :]                    # GLU "value" half            (h2, TB)
    g = h[h2:nh, :]                  # GLU "gate"  half            (h2, TB)
    pid_term = h[nh:nh + 1, :]       # err_ftrs . pid + w_const    (1,  TB)

    z1 = a * jax.nn.sigmoid(g)                                      # (h2, TB)

    if nhl == 1:
        # Specialized default path: keep the tiny heads off the MXU entirely.
        z2 = jax.nn.sigmoid(
            jnp.sum(z1 * w2_ref[...], axis=0, keepdims=True))       # (1, TB)
        z3 = z2
        sigma_adjust = 0.5 * jnp.tanh(z2 * wstd_ref[...])           # (1, TB)
    else:
        z2 = jax.nn.sigmoid(
            jnp.dot(w2_ref[...], z1, preferred_element_type=jnp.float32,
                    precision=lax.Precision.HIGHEST))               # (nhl, TB)
        z3 = jnp.sum(z2, axis=0, keepdims=True)                     # (1, TB)
        sigma_adjust = 0.5 * jnp.tanh(
            jnp.dot(wstd_ref[...], z2, preferred_element_type=jnp.float32,
                    precision=lax.Precision.HIGHEST))               # (1, TB)

    mu = z3 * pid_term
    sig = jnp.clip(sp_ref[0] + sigma_adjust, std_min, std_max)

    # Lane-dense direct row stores (no concatenate / lane shuffle).
    out_ref[0:1, :] = mu
    out_ref[1:2, :] = sig


class NetDiscPIDGPallas:
    """JAX/Pallas port of NetDiscPIDG. forward(x, eps) -> (mu, sigma) of the Normal."""

    def __init__(self, nin, n_hidden=128, n_hl=1, std_min=0.03, std_max=2.0,
                 masked_ftrs=(), ftr_normalizer=None, ctrl_ftrs=slice(3, 6), seed=0):
        assert n_hidden % 2 == 0, "GLU requires an even n_hidden"
        self.std_min = float(std_min)
        self.std_max = float(std_max)
        self.nin_full = int(nin)
        self.nh = int(n_hidden)
        self.n_hl = int(n_hl)
        self.ctrl = ctrl_ftrs
        self.len_ctrftr = ctrl_ftrs.stop - ctrl_ftrs.start
        assert self.len_ctrftr == 3, "pid parameter is hard-coded to length 3"

        masked = sorted(set(int(i) for i in masked_ftrs))
        keep = np.array([i for i in range(nin) if i not in masked], dtype=np.int32)
        nin_eff = int(keep.shape[0])
        assert ctrl_ftrs.stop <= nin_eff
        self._keep = keep
        if ftr_normalizer is not None:
            norm = np.asarray(ftr_normalizer, dtype=np.float32).reshape(-1)
            assert norm.shape[0] == nin_eff
        else:
            norm = np.ones((nin_eff,), dtype=np.float32)
        self._norm = jnp.asarray(norm)

        H, h2 = self.nh, self.nh // 2
        self.Hp = _round_up(H + 1, 8)       # sublane-padded fc1+pid row count
        key = jax.random.PRNGKey(seed)
        k1, k2, k3, k4 = jax.random.split(key, 4)

        # PyTorch parameter shapes / inits.
        W1 = 5.0 * jax.random.normal(k1, (H, nin_eff), dtype=jnp.float32)   # fc1.weight N(0,5)
        bound = 1.0 / np.sqrt(nin_eff)
        b1 = jax.random.uniform(k2, (H,), dtype=jnp.float32,
                                minval=-bound, maxval=bound)                # fc1.bias default
        W2 = jax.random.normal(k3, (self.n_hl, h2), dtype=jnp.float32)      # fc2.weight N(0,1)
        Wstd = jax.random.normal(k4, (1, self.n_hl), dtype=jnp.float32)     # fc_std.weight N(0,1)
        pid = jnp.asarray(np.array([3.0, 0.3, 0.03], np.float32) / self.n_hl)
        w_const = 0.1

        # Originals kept for the pure-JAX reference.
        self._W1, self._b1, self._W2, self._Wstd = W1, b1, W2, Wstd
        self._pid, self._w_const = pid, w_const

        # ---- fold mask + normalizer + pid + w_const into one (transposed) operand ----
        # W_bigT rows 0..H-1 : fc1 weight with normalizer folded (raw-x column space)
        # W_bigT row  H      : normalizer-scaled pid coefficients on the ctrl features
        # W_bigT rows H+1..  : zero padding up to Hp (sublane alignment)
        W1_scaled = W1 * jnp.asarray(norm)[None, :]                          # (H, nin_eff)
        wbigT = jnp.zeros((self.Hp, self.nin_full), dtype=jnp.float32)
        wbigT = wbigT.at[:H, keep].set(W1_scaled)
        eff_ctrl = np.arange(nin_eff)[ctrl_ftrs]        # ctrl idx in masked space
        raw_ctrl = keep[eff_ctrl]                       # ...and in raw-x space
        wbigT = wbigT.at[H, raw_ctrl].set(jnp.asarray(norm[eff_ctrl]) * pid)
        self.wbigT = wbigT                                                   # (Hp, nin_full)

        bbigT = jnp.zeros((self.Hp, 1), dtype=jnp.float32)
        bbigT = bbigT.at[:H, 0].set(b1)
        bbigT = bbigT.at[H, 0].set(w_const)
        self.bbigT = bbigT                                                   # (Hp, 1)

        if self.n_hl == 1:
            self.w2_k = W2.T          # (h2, 1) -> VPU multiply + sublane reduce
        else:
            self.w2_k = W2            # (n_hl, h2) -> small MXU matmul against z1
        self.wstd_k = Wstd            # (1, n_hl)

    def forward(self, x, eps=0.0):
        x = jnp.asarray(x, jnp.float32)
        assert x.ndim == 2 and x.shape[1] == self.nin_full
        B = int(x.shape[0])
        nin_full, H, h2, nhl, Hp = self.nin_full, self.nh, self.nh // 2, self.n_hl, self.Hp

        eps_arr = jnp.asarray(eps, jnp.float32)
        if eps_arr.ndim != 0:
            raise ValueError("eps must be a scalar")
        sigma_perf = jnp.exp(3.5 * eps_arr - 4.0).reshape(1)     # SMEM scalar

        # Batch tiling with the batch on the lane (last) dimension.
        TB, Bp = _choose_batch_tile(B)
        if Bp != B:
            x = jnp.pad(x, ((0, Bp - B), (0, 0)))
        xT = x.T                                                 # (nin_full, Bp)

        kernel = functools.partial(_netdiscpidg_kernel, h2=h2, nh=H, nhl=nhl,
                                   std_min=self.std_min, std_max=self.std_max)

        flops = 2 * Bp * (Hp * nin_full + h2 * nhl + 2 * nhl) + 4 * Bp
        transcendentals = Bp * (h2 + nhl + 1)
        bytes_accessed = 4 * (Bp * nin_full + Hp * nin_full + Hp
                              + self.w2_k.size + self.wstd_k.size + 2 * Bp + 1)

        out = pl.pallas_call(
            kernel,
            out_shape=jax.ShapeDtypeStruct((2, Bp), jnp.float32),
            grid=(Bp // TB,),
            in_specs=[
                pl.BlockSpec(memory_space=pltpu.MemorySpace.SMEM),   # sigma_perf scalar
                pl.BlockSpec((nin_full, TB), lambda i: (0, i)),      # xT (batch on lanes)
                pl.BlockSpec((Hp, nin_full), lambda i: (0, 0)),      # W_bigT (VMEM-resident)
                pl.BlockSpec((Hp, 1), lambda i: (0, 0)),             # b_bigT
                pl.BlockSpec(self.w2_k.shape, lambda i: (0, 0)),     # fc2 weight
                pl.BlockSpec(self.wstd_k.shape, lambda i: (0, 0)),   # fc_std weight
            ],
            out_specs=pl.BlockSpec((2, TB), lambda i: (0, i)),       # lane-dense output
            compiler_params=pltpu.CompilerParams(
                dimension_semantics=("parallel",),
                vmem_limit_bytes=32 * 1024 * 1024),
            cost_estimate=pl.CostEstimate(flops=int(flops),
                                          transcendentals=int(transcendentals),
                                          bytes_accessed=int(bytes_accessed)),
        )(sigma_perf, xT, self.wbigT, self.bbigT, self.w2_k, self.wstd_k)

        mu = out[0, :B]
        sig = out[1, :B]
        # TODO(synk): PyTorch wraps (mu, sig) in torch.distributions.Normal, optionally
        # also returns z3 (verbose) and has a 0.01%-probability debug print; we return
        # the distribution parameters instead.
        return mu, sig


def _reference_forward(model: NetDiscPIDGPallas, x, eps=0.0):
    """Pure-JAX transcription of the PyTorch forward (for correctness checking)."""
    x = jnp.asarray(x, jnp.float32)
    x_ = x[:, model._keep]
    x_ = x_ * model._norm
    err_ftrs = x_[:, model.ctrl]
    h2 = model.nh // 2
    y = jnp.dot(x_, model._W1.T, precision=lax.Precision.HIGHEST) + model._b1
    z1 = y[:, :h2] * jax.nn.sigmoid(y[:, h2:])                     # F.glu
    z2 = jax.nn.sigmoid(jnp.dot(z1, model._W2.T, precision=lax.Precision.HIGHEST))
    z3 = jnp.sum(z2, axis=1, keepdims=True)
    effective_weights = z3 * model._pid[None, :]
    effective_bias = z3 * model._w_const
    mu = jnp.sum(effective_weights * err_ftrs, axis=1, keepdims=True) + effective_bias
    sigma_adjust = 0.5 * jnp.tanh(
        jnp.dot(z2, model._Wstd.T, precision=lax.Precision.HIGHEST))
    sigma_perf = jnp.exp(3.5 * jnp.asarray(eps, jnp.float32) - 4.0)
    sig = jnp.clip(sigma_perf + sigma_adjust, model.std_min, model.std_max)
    return mu[:, 0], sig[:, 0]


if __name__ == "__main__":
    B, NIN, NH = 16, 10, 32
    key = jax.random.PRNGKey(0)
    x = jax.random.normal(key, (B, NIN), dtype=jnp.float32)

    # Case 1: default n_hl=1 (specialized VPU heads), with masking + normalization so
    # the weight-folding path is validated.
    ftr_norm = np.linspace(0.5, 1.5, NIN - 1).astype(np.float32)   # nin_eff = NIN - 1
    m1 = NetDiscPIDGPallas(nin=NIN, n_hidden=NH, n_hl=1,
                           masked_ftrs=[7], ftr_normalizer=ftr_norm, seed=0)
    mu1, sig1 = m1.forward(x, eps=0.1)
    jax.block_until_ready((mu1, sig1))
    mu1_ref, sig1_ref = _reference_forward(m1, x, eps=0.1)
    # Tolerance: fc1 is initialized with std=5, so tiny f32 summation-order differences
    # (folded vs. unfolded normalizer) get amplified through the GLU; 1e-3 still
    # catches any structural/fold error (which would be O(1)).
    np.testing.assert_allclose(np.asarray(mu1), np.asarray(mu1_ref), rtol=1e-3, atol=1e-3)
    np.testing.assert_allclose(np.asarray(sig1), np.asarray(sig1_ref), rtol=1e-3, atol=1e-3)

    # Case 2: n_hl=2 exercises the general (matmul-head) path, no masking/normalizer.
    m2 = NetDiscPIDGPallas(nin=NIN, n_hidden=NH, n_hl=2, seed=1)
    mu2, sig2 = m2.forward(x, eps=0.0)
    jax.block_until_ready((mu2, sig2))
    mu2_ref, sig2_ref = _reference_forward(m2, x, eps=0.0)
    np.testing.assert_allclose(np.asarray(mu2), np.asarray(mu2_ref), rtol=1e-3, atol=1e-3)
    np.testing.assert_allclose(np.asarray(sig2), np.asarray(sig2_ref), rtol=1e-3, atol=1e-3)

    print("KERNEL_OK")
</pallas_src>

<mosaic_0001>
module attributes {stable_mosaic.version = 11 : i64} {
  func.func @_netdiscpidg_kernel(%arg0: i32, %arg1: memref<1xf32, #tpu.memory_space<smem>>, %arg2: memref<10x128xf32, #tpu.memory_space<vmem>>, %arg3: memref<40x10xf32, #tpu.memory_space<vmem>>, %arg4: memref<40x1xf32, #tpu.memory_space<vmem>>, %arg5: memref<16x1xf32, #tpu.memory_space<vmem>>, %arg6: memref<1x1xf32, #tpu.memory_space<vmem>>, %arg7: memref<2x128xf32, #tpu.memory_space<vmem>>) attributes {dimension_semantics = [#tpu.dimension_semantics<parallel>], iteration_bounds = array<i64: 1>, scalar_prefetch = 0 : i64, scratch_operands = 0 : i64, tpu.core_type = #tpu.core_type<tc>, window_params = [{transform_indices = @transform_0, window_bounds = array<i64: 1>}, {transform_indices = @transform_1, window_bounds = array<i64: 10, 128>}, {pipeline_mode = #tpu.pipeline_mode<synchronous>, transform_indices = @transform_2, window_bounds = array<i64: 40, 10>}, {pipeline_mode = #tpu.pipeline_mode<synchronous>, transform_indices = @transform_3, window_bounds = array<i64: 40, 1>}, {pipeline_mode = #tpu.pipeline_mode<synchronous>, transform_indices = @transform_4, window_bounds = array<i64: 16, 1>}, {pipeline_mode = #tpu.pipeline_mode<synchronous>, transform_indices = @transform_5, window_bounds = array<i64: 1, 1>}, {transform_indices = @transform_6, window_bounds = array<i64: 2, 128>}]} {
    %c0 = arith.constant 0 : index
    %c0_0 = arith.constant 0 : index
    %0 = vector.load %arg3[%c0, %c0_0] : memref<40x10xf32, #tpu.memory_space<vmem>>, vector<40x10xf32>
    %c0_1 = arith.constant 0 : index
    %c0_2 = arith.constant 0 : index
    %1 = vector.load %arg2[%c0_1, %c0_2] : memref<10x128xf32, #tpu.memory_space<vmem>>, vector<10x128xf32>
    %cst = arith.constant dense<0.000000e+00> : vector<40x128xf32>
    %2 = tpu.matmul %0, %1, %cst {dimension_numbers = #tpu.dot_dimension_numbers<[1], [0], [0], [1], [0, 0, 1, 1], [], []>, precision = #tpu.contract_precision<fp32>} : vector<40x10xf32>, vector<10x128xf32>, vector<40x128xf32> -> vector<40x128xf32>
    %c0_3 = arith.constant 0 : index
    %c0_4 = arith.constant 0 : index
    %3 = vector.load %arg4[%c0_3, %c0_4] : memref<40x1xf32, #tpu.memory_space<vmem>>, vector<40x1xf32>
    %4 = vector.broadcast %3 : vector<40x1xf32> to vector<40x128xf32>
    %5 = arith.addf %2, %4 : vector<40x128xf32>
    %6 = vector.extract_strided_slice %5 {offsets = [0, 0], sizes = [16, 128], strides = [1, 1]} : vector<40x128xf32> to vector<16x128xf32>
    %7 = vector.extract_strided_slice %5 {offsets = [16, 0], sizes = [16, 128], strides = [1, 1]} : vector<40x128xf32> to vector<16x128xf32>
    %8 = vector.extract_strided_slice %5 {offsets = [32, 0], sizes = [1, 128], strides = [1, 1]} : vector<40x128xf32> to vector<1x128xf32>
    %9 = arith.negf %7 : vector<16x128xf32>
    %10 = math.exp %9 : vector<16x128xf32>
    %cst_5 = arith.constant 1.000000e+00 : f32
    %11 = vector.broadcast %cst_5 : f32 to vector<16x128xf32>
    %12 = arith.addf %11, %10 : vector<16x128xf32>
    %13 = arith.divf %11, %12 : vector<16x128xf32>
    %14 = arith.mulf %6, %13 : vector<16x128xf32>
    %c0_6 = arith.constant 0 : index
    %c0_7 = arith.constant 0 : index
    %15 = vector.load %arg5[%c0_6, %c0_7] : memref<16x1xf32, #tpu.memory_space<vmem>>, vector<16x1xf32>
    %16 = vector.broadcast %15 : vector<16x1xf32> to vector<16x128xf32>
    %17 = arith.mulf %14, %16 : vector<16x128xf32>
    %cst_8 = arith.constant dense<0.000000e+00> : vector<128xf32>
    %18 = vector.multi_reduction <add>, %17, %cst_8 [0] : vector<16x128xf32> to vector<128xf32>
    %19 = vector.shape_cast %18 : vector<128xf32> to vector<1x128xf32>
    %20 = arith.negf %19 : vector<1x128xf32>
    %21 = math.exp %20 : vector<1x128xf32>
    %cst_9 = arith.constant 1.000000e+00 : f32
    %22 = vector.broadcast %cst_9 : f32 to vector<1x128xf32>
    %23 = arith.addf %22, %21 : vector<1x128xf32>
    %24 = arith.divf %22, %23 : vector<1x128xf32>
    %c0_10 = arith.constant 0 : index
    %c0_11 = arith.constant 0 : index
    %25 = vector.load %arg6[%c0_10, %c0_11] : memref<1x1xf32, #tpu.memory_space<vmem>>, vector<1x1xf32>
    %26 = vector.broadcast %25 : vector<1x1xf32> to vector<1x128xf32>
    %27 = arith.mulf %24, %26 : vector<1x128xf32>
    %28 = math.tanh %27 : vector<1x128xf32>
    %cst_12 = arith.constant 5.000000e-01 : f32
    %29 = vector.broadcast %cst_12 : f32 to vector<1x128xf32>
    %30 = arith.mulf %29, %28 : vector<1x128xf32>
    %31 = arith.mulf %24, %8 : vector<1x128xf32>
    %c0_13 = arith.constant 0 : index
    %32 = memref.load %arg1[%c0_13] : memref<1xf32, #tpu.memory_space<smem>>
    %33 = vector.broadcast %32 : f32 to vector<1x128xf32>
    %34 = arith.addf %33, %30 : vector<1x128xf32>
    %cst_14 = arith.constant 3.000000e-02 : f32
    %cst_15 = arith.constant 2.000000e+00 : f32
    %35 = vector.broadcast %cst_14 : f32 to vector<1x128xf32>
    %36 = arith.maximumf %35, %34 : vector<1x128xf32>
    %37 = vector.broadcast %cst_15 : f32 to vector<1x128xf32>
    %38 = arith.minimumf %37, %36 : vector<1x128xf32>
    %c0_16 = arith.constant 0 : index
    %c0_17 = arith.constant 0 : index
    %39 = vector.load %arg7[%c0_16, %c0_17] : memref<2x128xf32, #tpu.memory_space<vmem>>, vector<1x128xf32>
    tpu.vector_store %arg7[%c0_16, %c0_17], %31 {strides = array<i32>} : memref<2x128xf32, #tpu.memory_space<vmem>>, vector<1x128xf32>,
    %c1 = arith.constant 1 : index
    %c0_18 = arith.constant 0 : index
    %40 = vector.load %arg7[%c1, %c0_18] : memref<2x128xf32, #tpu.memory_space<vmem>>, vector<1x128xf32>
    tpu.vector_store %arg7[%c1, %c0_18], %38 {strides = array<i32>} : memref<2x128xf32, #tpu.memory_space<vmem>>, vector<1x128xf32>,
    return
  }
  func.func @transform_0(%arg0: i32) -> i32 {
    %c0_i32 = arith.constant 0 : i32
    %c0_i32_0 = arith.constant 0 : i32
    return %c0_i32 : i32
  }
  func.func @transform_1(%arg0: i32) -> (i32, i32) {
    %c0_i32 = arith.constant 0 : i32
    %c0_i32_0 = arith.constant 0 : i32
    return %c0_i32, %arg0 : i32, i32
  }
  func.func @transform_2(%arg0: i32) -> (i32, i32) {
    %c0_i32 = arith.constant 0 : i32
    %c0_i32_0 = arith.constant 0 : i32
    %c0_i32_1 = arith.constant 0 : i32
    return %c0_i32, %c0_i32_0 : i32, i32
  }
  func.func @transform_3(%arg0: i32) -> (i32, i32) {
    %c0_i32 = arith.constant 0 : i32
    %c0_i32_0 = arith.constant 0 : i32
    %c0_i32_1 = arith.constant 0 : i32
    return %c0_i32, %c0_i32_0 : i32, i32
  }
  func.func @transform_4(%arg0: i32) -> (i32, i32) {
    %c0_i32 = arith.constant 0 : i32
    %c0_i32_0 = arith.constant 0 : i32
    %c0_i32_1 = arith.constant 0 : i32
    return %c0_i32, %c0_i32_0 : i32, i32
  }
  func.func @transform_5(%arg0: i32) -> (i32, i32) {
    %c0_i32 = arith.constant 0 : i32
    %c0_i32_0 = arith.constant 0 : i32
    %c0_i32_1 = arith.constant 0 : i32
    return %c0_i32, %c0_i32_0 : i32, i32
  }
  func.func @transform_6(%arg0: i32) -> (i32, i32) {
    %c0_i32 = arith.constant 0 : i32
    %c0_i32_0 = arith.constant 0 : i32
    return %c0_i32, %arg0 : i32, i32
  }
}

</mosaic_0001>

<bundles_post_ra>
// kernel: tpu_custom_call.1
= control target key start
LH: loop header
LB: loop body
LE: loop exit
PB: predicated region body
PF: predicated region fallthrough
CT: control target
= control target key end

     0   :  { %s691_s0 = inlined_call_operand.<no memory space> [shape: f32[1], index: 0, kind: input, shape index: {}]   ;;  %s692_s1 = inlined_call_operand.vmem [shape: f32[10,128], index: 1, kind: input, shape index: {}]   ;;  %s693_s2 = inlined_call_operand.vmem [shape: f32[40,10], index: 2, kind: input, shape index: {}]   ;;  %s694_s3 = inlined_call_operand.vmem [shape: f32[40,1], index: 3, kind: input, shape index: {}]   ;;  %s695_s4 = inlined_call_operand.vmem [shape: f32[16,1], index: 4, kind: input, shape index: {}]   ;;  %s696_s5 = inlined_call_operand.<no memory space> [shape: f32[1,1], index: 5, kind: input, shape index: {}]   ;;  %s697_s6 = inlined_call_operand.hbm [shape: f32[2,128], index: 6, kind: output, shape index: {}]  }
   0x1   :  { %v12_v0 = vstv %s696_s5 }
   0x2   :  { %13 = vst [vmem:[#allocation3] sm:$0x1] %v12_v0 }
   0x3   :  { %v33_v1 = vld [vmem:[%s692_s1 + $0x8] sm:$0x3]  ;;  %vm80_vm0 = vcmask 1041408   ;;  %v32_v2 = vld [vmem:[%s692_s1] sm:$0xff]  ;;  %v30_v3 = vld [vmem:[%s693_s2 + $0x18] sm:$0xff]  ;;  %vm64_vm1 = vcmask 80896  }
   0x4   :  { %v82_v4 = vsel %vm80_vm0, %v33_v1, 0  ;;  %v582_v5 = vand.u32 4294901760, %v32_v2  ;;  %v75_v6 = vsel %vm64_vm1, %v30_v3, 0  ;;  %v27_v7 = vld [vmem:[%s693_s2] sm:$0xff]  ;;  %v533_v13 = vmov 0   ;;  %v36_v14 = vld [vmem:[%s694_s3 + $0x10] sm:$0xff] }
   0x5   :  { %v31_v8 = vld [vmem:[%s693_s2 + $0x20] sm:$0xff]  ;;  %v591_v9 = vand.u32 4294901760, %v82_v4  ;;  %v593_v10 = vand.u32 4294901760, %v75_v6  ;;  %v66_v11 = vsel %vm64_vm1, %v27_v7, 0  ;;  %491 = vset.pattern.permute.xlu1 %v533_v13  ;;  %490 = vset.pattern.permute.xlu0 %v533_v13  ;;  %v28_v19 = vld [vmem:[%s693_s2 + $0x8] sm:$0xff]  ;;  %v29_v23 = vld [vmem:[%s693_s2 + $0x10] sm:$0xff] }
   0x6   :  { %v78_v12 = vsel %vm64_vm1, %v31_v8, 0  ;;  %v34_v15 = vld [vmem:[%s694_s3] sm:$0xff]  ;;  %v164_v16 = vsub.f32 %v32_v2, %v582_v5  ;;  %v604_v17 = vand.u32 4294901760, %v66_v11  ;;  %51 = vperm.xlu0 %490, %v36_v14   ;;  %v69_v22 = vsel %vm64_vm1, %v28_v19, 0 }
   0x7   :  { %v606_v18 = vand.u32 4294901760, %v78_v12  ;;  %41 = vperm.xlu1 %491, %v34_v15   ;;  %484 = vmatpush.msra.mxu2 %v591_v9  ;;  %v614_v20 = vsub.f32 %v75_v6, %v593_v10  ;;  %v158_v21 = vsub.f32 %v82_v4, %v591_v9 }
   0x8   :  { %99 = vmatpush.msra.mxu0 %v591_v9 }
   0x9   :  { %14 = vsyncpa [#allocation5], 0  ;;  %v165_v24 = vand.u32 4294901760, %v164_v16  ;;  %v103_v25 = vsub.f32 %v66_v11, %v604_v17  ;;  %v623_v26 = vsub.f32 %v78_v12, %v606_v18  ;;  %v625_v27 = vand.u32 4294901760, %v69_v22  ;;  %492 = vset.pattern.permute.xlu2 %v533_v13  ;;  %485 = vmatpush.msra.mxu2 %v582_v5  ;;  %v37_v37 = vld [vmem:[%s694_s3 + $0x18] sm:$0xff]  ;;  %v35_v38 = vld [vmem:[%s694_s3 + $0x8] sm:$0xff] }
   0xa   :  { %v128_v28 = vand.u32 4294901760, %v614_v20  ;;  %v159_v29 = vand.u32 4294901760, %v158_v21  ;;  %101 = vmatpush.msra.mxu0 %v582_v5  ;;  %v72_v30 = vsel %vm64_vm1, %v29_v23, 0  ;;  %v38_v50 = vld [vmem:[%s694_s3 + $0x20] sm:$0xff]  ;;  %v408_v57 = vld [vmem:[%s695_s4 + $0x8] sm:$0xff]  ;;  %s534_s24 = smov [#allocation4]  }
   0xb   :  { %206 = vmatpush.msrb.mxu2 %v158_v21  ;;  %v166_v31 = vsub.f32 %v164_v16, %v165_v24  ;;  %v104_v32 = vand.u32 4294901760, %v103_v25  ;;  %v111_v33 = vsub.f32 %v69_v22, %v625_v27  ;;  %v136_v36 = vand.u32 4294901760, %v623_v26  ;;  %v447_v54 = vld [vmem:[#allocation3] sm:$0x1]  ;;  %s470_s25 = sshll.u32 %s534_s24, 4  ;;  %s472_s28 = sshll.u32 %s697_s6, 4  ;;  %s471_s25 = int_to_ptr.vmem [resolvable:$true] %s470_s25  ;;  %s473_s28 = int_to_ptr.hbm [resolvable:$true] %s472_s28 }
   0xc   :  { %v129_v34 = vsub.f32 %v614_v20, %v128_v28  ;;  %v160_v35 = vsub.f32 %v158_v21, %v159_v29  ;;  %302 = vmatpush.msrb.mxu0 %v159_v29  ;;  %v118_v41 = vand.u32 4294901760, %v72_v30  ;;  %v407_v56 = vld [vmem:[%s695_s4] sm:$0xff] }
   0xd   :  { %v105_v39 = vsub.f32 %v103_v25, %v104_v32  ;;  %209 = vmatpush.msrb.mxu2 %v164_v16  ;;  %v112_v40 = vand.u32 4294901760, %v111_v33  ;;  %v167_v44 = vand.u32 4294901760, %v166_v31  ;;  %v137_v46 = vsub.f32 %v623_v26, %v136_v36  ;;  %411 = vperm.xlu2 %492, %v407_v56  }
   0xe   :  { %v130_v42 = vand.u32 4294901760, %v129_v34  ;;  %v161_v43 = vand.u32 4294901760, %v160_v35  ;;  %306 = vmatpush.msrb.mxu0 %v165_v24  ;;  %56 = vperm.xlu0 %490, %v37_v37   ;;  %v119_v48 = vsub.f32 %v72_v30, %v118_v41 }
   0xf   :  { %v106_v45 = vand.u32 4294901760, %v105_v39  ;;  %46 = vperm.xlu1 %491, %v35_v38   ;;  %v113_v47 = vsub.f32 %v111_v33, %v112_v40  ;;  %v138_v49 = vand.u32 4294901760, %v137_v46 }
  0x10   :  { %131 = vmatmul.f32.vlgmr.msra.gmra.mxu2 %v130_v42  ;;  %486 = vmatpush.msra.mxu3 %v161_v43  ;;  %v120_v52 = vand.u32 4294901760, %v119_v48 }
  0x11   :  { %162 = vmatpush.msra.mxu1 %v161_v43  ;;  %107 = vmatmul.f32.vlgmr.msra.gmra.mxu0 %v106_v45  ;;  %v114_v51 = vand.u32 4294901760, %v113_v47 }
  0x12   :  { %487 = vmatpush.msra.mxu3 %v167_v44  ;;  %v121_v53 = vsub.f32 %v119_v48, %v120_v52 }
  0x13   :  { %182 = vmatmul.f32.vlgmr.msra.gmra.mxu3 %v593_v10  ;;  %168 = vmatpush.msra.mxu1 %v167_v44 }
  0x14   :  { %251 = vmatpush.msrb.mxu3 %v591_v9  ;;  %170 = vmatmul.f32.vlgmr.msra.gmra.mxu1 %v604_v17  ;;  %v122_v55 = vand.u32 4294901760, %v121_v53 }
  0x15   :  { %343 = vmatpush.msrb.mxu1 %v591_v9  ;;  %416 = vperm.xlu2 %492, %v408_v57  }
  0x16   :  { %253 = vmatpush.msrb.mxu3 %v582_v5  ;;  %450 = vperm.xlu0 %490, %v447_v54  }
  0x17   :  { %345 = vmatpush.msrb.mxu1 %v582_v5  ;;  %61 = vperm.xlu1 %491, %v38_v50  }
  0x18   :  { %139 = vmatmul.f32.gmra.mxu2 %v138_v49 }
  0x19   :  { %115 = vmatmul.f32.gmra.mxu0 %v114_v51 }
  0x1b   :  { %186 = vmatmul.f32.gmra.mxu3 %v606_v18 }
  0x1c   :  { %174 = vmatmul.f32.gmra.mxu1 %v625_v27 }
  0x20   :  { %212 = vmatmul.f32.vlgmr.msrb.gmra.mxu2 %v103_v25 }
  0x21   :  { %123 = vmatmul.f32.gmra.mxu0 %v122_v55 }
  0x23   :  { %257 = vmatmul.f32.vlgmr.msrb.gmra.mxu3 %v104_v32 }
  0x24   :  { %178 = vmatmul.f32.gmra.mxu1 %v118_v41 }
  0x28   :  { %217 = vmatmul.f32.gmra.mxu2 %v111_v33 }
  0x29   :  { %308 = vmatmul.f32.vlgmr.msrb.gmra.mxu0 %v604_v17 }
  0x2b   :  { %263 = vmatmul.f32.gmra.mxu3 %v112_v40 }
  0x2c   :  { %347 = vmatmul.f32.vlgmr.msrb.gmra.mxu1 %v604_v17 }
  0x30   :  { %222 = vmatmul.f32.gmra.mxu2 %v119_v48 }
  0x31   :  { %312 = vmatmul.f32.gmra.mxu0 %v625_v27 }
  0x33   :  { %269 = vmatmul.f32.gmra.mxu3 %v120_v52 }
  0x34   :  { %351 = vmatmul.f32.gmra.mxu1 %v625_v27 }
  0x38   :  { %227 = vmatmul.f32.gmra.mxu2 %v614_v20 }
  0x39   :  { %316 = vmatmul.f32.gmra.mxu0 %v118_v41 }
  0x3b   :  { %275 = vmatmul.f32.gmra.mxu3 %v128_v28 }
  0x3c   :  { %355 = vmatmul.f32.gmra.mxu1 %v118_v41 }
  0x40   :  { %232 = vmatmul.f32.gmra.mxu2 %v623_v26 }
  0x41   :  { %320 = vmatmul.f32.gmra.mxu0 %v593_v10 }
  0x43   :  { %281 = vmatmul.f32.gmra.mxu3 %v136_v36 }
  0x44   :  { %359 = vmatmul.f32.gmra.mxu1 %v593_v10 }
  0x49   :  { %324 = vmatmul.f32.gmra.mxu0 %v606_v18 }
  0x4c   :  { %363 = vmatmul.f32.gmra.mxu1 %v606_v18 }
  0x78   :  { %v52_v14 = vpop.permute.xlu0 %51 }
  0x79   :  { %v42_v58 = vpop.permute.xlu1 %41 }
  0x80   :  { %v57_v22 = vpop.permute.xlu0 %56 }
  0x81   :  { %v47_v61 = vpop.permute.xlu1 %46 }
  0x89   :  { %v62_v4 = vpop.permute.xlu1 %61 }
  0x8e   :  { %v108_v59 = vpop.f32.mrf.mxu0 }
  0x8f   :  { %v109_v60 = vadd.f32 %v108_v59, %v42_v58 }
  0x91   :  { %v171_v62 = vpop.f32.mrf.mxu1 }
  0x92   :  { %v172_v63 = vadd.f32 %v171_v62, %v109_v60 }
  0x93   :  { %v132_v0 = vpop.f32.mrf.mxu2 }
  0x94   :  { %v133_v25 = vadd.f32 %v132_v0, %v57_v22 }
  0x96   :  { %v183_v1 = vpop.f32.mrf.mxu3  ;;  %v116_v2 = vpop.f32.mrf.mxu0 }
  0x97   :  { %v184_v31 = vadd.f32 %v183_v1, %v133_v25  ;;  %v117_v45 = vadd.f32 %v116_v2, %v47_v61  ;;  %v412_v61 = vpop.permute.xlu2 %411 }
  0x99   :  { %v175_v3 = vpop.f32.mrf.mxu1 }
  0x9a   :  { %v176_v50 = vadd.f32 %v175_v3, %v117_v45 }
  0x9b   :  { %v140_v5 = vpop.f32.mrf.mxu2 }
  0x9c   :  { %v141_v6 = vadd.f32 %v140_v5, %v62_v4 }
  0x9e   :  { %v187_v7 = vpop.f32.mrf.mxu3  ;;  %v124_v8 = vpop.f32.mrf.mxu0 }
  0x9f   :  { %v676_v9 = vadd.f32 %v187_v7, %v141_v6  ;;  %v125_v17 = vadd.f32 %v124_v8, %v52_v14 }
  0xa1   :  { %v179_v10 = vpop.f32.mrf.mxu1 }
  0xa2   :  { %v180_v21 = vadd.f32 %v179_v10, %v125_v17 }
  0xa3   :  { %v213_v11 = vpop.f32.mrf.mxu2 }
  0xa4   :  { %v214_v51 = vadd.f32 %v213_v11, %v172_v63 }
  0xa6   :  { %v258_v12 = vpop.f32.mrf.mxu3  ;;  %v309_v13 = vpop.f32.mrf.mxu0 }
  0xa7   :  { %v259_v55 = vadd.f32 %v258_v12, %v214_v51 }
  0xa9   :  { %v678_v15 = vpop.f32.mrf.mxu1  ;;  %v310_v0 = vadd.f32 %v309_v13, %v259_v55 }
  0xab   :  { %v218_v16 = vpop.f32.mrf.mxu2  ;;  %v349_v8 = vadd.f32 %v678_v15, %v310_v0 }
  0xac   :  { %v219_v53 = vadd.f32 %v218_v16, %v176_v50 }
  0xae   :  { %v264_v18 = vpop.f32.mrf.mxu3  ;;  %v313_v19 = vpop.f32.mrf.mxu0 }
  0xaf   :  { %v265_v58 = vadd.f32 %v264_v18, %v219_v53  ;;  %v417_v18 = vpop.permute.xlu2 %416 }
  0xb1   :  { %v680_v20 = vpop.f32.mrf.mxu1  ;;  %v314_v3 = vadd.f32 %v313_v19, %v265_v58 }
  0xb3   :  { %v223_v23 = vpop.f32.mrf.mxu2  ;;  %v353_v12 = vadd.f32 %v680_v20, %v314_v3 }
  0xb4   :  { %v224_v24 = vadd.f32 %v223_v23, %v180_v21 }
  0xb6   :  { %v270_v26 = vpop.f32.mrf.mxu3  ;;  %v317_v27 = vpop.f32.mrf.mxu0 }
  0xb7   :  { %v271_v28 = vadd.f32 %v270_v26, %v224_v24 }
  0xb9   :  { %v318_v29 = vadd.f32 %v317_v27, %v271_v28  ;;  %v356_v30 = vpop.f32.mrf.mxu1 }
  0xbb   :  { %v357_v32 = vadd.f32 %v356_v30, %v318_v29  ;;  %v228_v33 = vpop.f32.mrf.mxu2 }
  0xbc   :  { %v229_v34 = vadd.f32 %v228_v33, %v184_v31 }
  0xbd   :  { %v481_v35 = vmul.f32 -1.442695, %v357_v32 }
  0xbe   :  { %v276_v36 = vpop.f32.mrf.mxu3  ;;  %v321_v37 = vpop.f32.mrf.mxu0 }
  0xbf   :  { %493 = vpow2.f32 %v481_v35  ;;  %v277_v38 = vadd.f32 %v276_v36, %v229_v34 }
  0xc1   :  { %v322_v39 = vadd.f32 %v321_v37, %v277_v38  ;;  %v360_v40 = vpop.f32.mrf.mxu1 }
  0xc3   :  { %v361_v41 = vadd.f32 %v360_v40, %v322_v39  ;;  %v233_v20 = vpop.f32.mrf.mxu2 }
  0xc4   :  { %v234_v31 = vadd.f32 %v233_v20, %v676_v9 }
  0xc5   :  { %v494_v42 = vpop.eup %493  ;;  %v482_v43 = vmul.f32 -1.442695, %v361_v41 }
  0xc6   :  { %v373_v44 = vadd.f32 1.0, %v494_v42  ;;  %v282_v32 = vpop.f32.mrf.mxu3  ;;  %v325_v36 = vpop.f32.mrf.mxu0 }
  0xc7   :  { %495 = vpow2.f32 %v482_v43  ;;  %v283_v34 = vadd.f32 %v282_v32, %v234_v31  ;;  %v451_v42 = vpop.permute.xlu0 %450 }
  0xc8   :  { %497 = vrcp.f32 %v373_v44  ;;  %v386_v59 = vand.u32 2147483648, %v373_v44  ;;  %vm380_vm3 = vweird.f32 %v373_v44  ;;  %v384_v60 = vand.u32 2147483647, %v373_v44 }
  0xc9   :  { %v326_v39 = vadd.f32 %v325_v36, %v283_v34  ;;  %v364_v43 = vpop.f32.mrf.mxu1 }
  0xca   :  { %v387_v4 = vor.u32 1.1754944e-38, %v386_v59  ;;  %vm385_vm5 = vcmp.eq.f32.partialorder %v384_v60, 8.507059e+37 }
  0xcd   :  { %v496_v46 = vpop.eup %495 }
  0xce   :  { %v498_v47 = vpop.eup %497  ;;  %v374_v48 = vadd.f32 1.0, %v496_v46  ;;  %v453_v46 = vperm.slane %v451_v42, 0 }
  0xcf   :  { %v376_v49 = vmul.f32 %v498_v47, %v373_v44  ;;  %vm381_vm2 = vweird.f32 %v498_v47 }
  0xd0   :  { %499 = vrcp.f32 %v374_v48  ;;  %vm382_vm4 = vmor %vm380_vm3, %vm381_vm2  ;;  %v401_v63 = vand.u32 2147483648, %v374_v48  ;;  %v399_v6 = vand.u32 2147483647, %v374_v48  ;;  %vm395_vm7 = vweird.f32 %v374_v48 }
  0xd1   :  { %v377_v52 = vsub.f32 1.0, %v376_v49 }
  0xd2   :  { %v402_v11 = vor.u32 1.1754944e-38, %v401_v63  ;;  %vm400_vm9 = vcmp.eq.f32.partialorder %v399_v6, 8.507059e+37 }
  0xd3   :  { %v378_v54 = vmul.f32 %v498_v47, %v377_v52  ;;  %v459_v52 = vstv %s691_s0 }
  0xd5   :  { %v379_v56 = vadd.f32 %v498_v47, %v378_v54 }
  0xd6   :  { %v500_v57 = vpop.eup %499 }
  0xd7   :  { %v391_v62 = vmul.f32 %v500_v57, %v374_v48  ;;  %v383_v1 = vsel %vm382_vm4, %v498_v47, %v379_v56  ;;  %vm396_vm6 = vweird.f32 %v500_v57  ;;  %v365_v47 = vadd.f32 %v364_v43, %v326_v39 }
  0xd8   :  { %v388_v7 = vsel %vm385_vm5, %v387_v4, %v383_v1  ;;  %vm397_vm8 = vmor %vm395_vm7, %vm396_vm6 }
  0xd9   :  { %v392_v2 = vsub.f32 1.0, %v391_v62  ;;  %v405_v14 = vmul.f32 %v388_v7, %v349_v8 }
  0xdb   :  { %v393_v5 = vmul.f32 %v500_v57, %v392_v2  ;;  %v419_v19 = vmul.f32 %v412_v61, %v405_v14 }
  0xdd   :  { %v394_v10 = vadd.f32 %v500_v57, %v393_v5 }
  0xdf   :  { %v398_v13 = vsel %vm397_vm8, %v500_v57, %v394_v10 }
  0xe0   :  { %v403_v16 = vsel %vm400_vm9, %v402_v11, %v398_v13 }
  0xe1   :  { %v406_v17 = vmul.f32 %v403_v16, %v353_v12 }
  0xe3   :  { %v420_v21 = vmul.f32 %v417_v18, %v406_v17 }
  0xe5   :  { %v421_v22 = vadd.f32 %v420_v21, %v419_v19 }
  0xe7   :  { %v422_v23 = vrot.slane %v421_v22, 4 }
  0xe9   :  { %v423_v24 = vadd.f32 %v422_v23, %v421_v22 }
  0xeb   :  { %v424_v25 = vrot.slane %v423_v24, 2 }
  0xed   :  { %v425_v26 = vadd.f32 %v424_v25, %v423_v24 }
  0xef   :  { %v426_v15 = vrot.slane %v425_v26, 1 }
  0xf1   :  { %v427_v27 = vadd.f32 %v426_v15, %v425_v26 }
  0xf3   :  { %v483_v28 = vmul.f32 -1.442695, %v427_v27 }
  0xf5   :  { %501 = vpow2.f32 %v483_v28 }
  0xfb   :  { %v502_v29 = vpop.eup %501 }
  0xfc   :  { %v431_v30 = vadd.f32 1.0, %v502_v29 }
  0xfe   :  { %503 = vrcp.f32 %v431_v30  ;;  %v443_v38 = vand.u32 2147483648, %v431_v30  ;;  %v441_v41 = vand.u32 2147483647, %v431_v30  ;;  %vm437_vm11 = vweird.f32 %v431_v30 }
 0x100   :  { %v444_v45 = vor.u32 1.1754944e-38, %v443_v38  ;;  %vm442_vm13 = vcmp.eq.f32.partialorder %v441_v41, 8.507059e+37 }
 0x104   :  { %v504_v33 = vpop.eup %503 }
 0x105   :  { %v433_v35 = vmul.f32 %v504_v33, %v431_v30  ;;  %vm438_vm10 = vweird.f32 %v504_v33 }
 0x106   :  { %vm439_vm12 = vmor %vm437_vm11, %vm438_vm10 }
 0x107   :  { %v434_v37 = vsub.f32 1.0, %v433_v35 }
 0x109   :  { %v435_v40 = vmul.f32 %v504_v33, %v434_v37 }
 0x10b   :  { %v436_v44 = vadd.f32 %v504_v33, %v435_v40 }
 0x10d   :  { %v440_v9 = vsel %vm439_vm12, %v504_v33, %v436_v44 }
 0x10e   :  { %v445_v48 = vsel %vm442_vm13, %v444_v45, %v440_v9 }
 0x10f   :  { %v454_v49 = vmul.f32 %v453_v46, %v445_v48  ;;  %v457_v50 = vmul.f32 %v445_v48, %v365_v47 }
 0x111   :  { %505 = vtanh.f32 %v454_v49  ;;  %463 = vst [vmem:[#allocation4] sm:$0x1] %v457_v50 }
 0x117   :  { %v506_v51 = vpop.eup %505 }
 0x118   :  { %v456_v53 = vmul.f32 0.5, %v506_v51 }
 0x11a   :  { %v460_v54 = vadd.f32 %v459_v52, %v456_v53 }
 0x11c   :  { %v461_v55 = vmax.f32 %v460_v54, 0.03 }
 0x11e   :  { %v462_v56 = vmin.f32 %v461_v55, 2.0 }
 0x120   :  { %464 = vst [vmem:[#allocation4 + $0x1] sm:$0x1] %v462_v56 }
 0x121   :  { %475 = dma.vmem_to_hbm [thread:$0]  %s471_s25, 32, %s473_s28, [#allocation5]  }
 0x122   :  { %531 = dma.done.wait [#allocation5], 32  }
 0x123   :  { %532 = vsyncadd [#allocation5], 4294967264 }
 0x124   :  { %480 = vsyncpa [#allocation5], 1 }

</bundles_post_ra>
